<compile_context>
chip_gen: v5e
topology: v5e:2x2
jax: 0.10.0
libtpu: 0.0.40
codegen_flags: <defaults>
</compile_context>

<pallas_src>
import math

import jax
import jax.numpy as jnp
from jax.experimental import pallas as pl
from jax.experimental.pallas import tpu as pltpu


def _round_up(x, m):
    return (x + m - 1) // m * m


# ----------------------------- kernels ------------------------------------ #

def _conv_ds_kernel(p_ref, w_ref, b_ref, o_ref):
    # p_ref: (1, THW, 9*Cin_p)  bf16 im2row patches for one spatial tile
    # w_ref: (9*Cin_p, Cout_p)  bf16 reshaped conv weights (grid-resident)
    # b_ref: (1, Cout_p)        f32 bias
    # o_ref: (1, THW, Cout_p)
    acc = jnp.dot(p_ref[0], w_ref[...], preferred_element_type=jnp.float32)
    o_ref[0] = (acc + b_ref[...]).astype(o_ref.dtype)


def _avgpool_ds_kernel(x_ref, p_ref, o_ref):
    # x_ref: (TM, 2*W2)  each row = one (n, c, out_row) 2-row window pair
    # p_ref: (2*W2, Wo)  constant 0.25-valued pooling/selection matrix
    # o_ref: (TM, Wo)
    o_ref[...] = jnp.dot(x_ref[...], p_ref[...],
                         preferred_element_type=jnp.float32).astype(o_ref.dtype)


# ----------------------------- wrappers ------------------------------------ #

def downsample_conv(x_nchw, weight_oihw, bias):
    """Conv2d(k=3, stride=2, pad=1) downsample.  x: (N, Cin, H, W) -> NCHW out."""
    n, cin, h, w = x_nchw.shape
    cout = weight_oihw.shape[0]
    ho = (h - 1) // 2 + 1          # = (h + 2*1 - 3)//2 + 1
    wo = (w - 1) // 2 + 1
    hw = ho * wo

    cin_p = _round_up(cin, 128)    # lane-dense K
    cout_p = _round_up(cout, 128)  # lane-dense output stores
    k_dim = 9 * cin_p

    thw = min(512, _round_up(hw, 8))   # spatial rows per tile (multiple of 8)
    hw_p = _round_up(hw, thw)

    # --- glue (XLA): NCHW -> NHWC, pad, im2row in bf16 ----------------------
    # TODO(synk): fuse the 3x3 patch extraction into the kernel with manual
    # DMAs over overlapping row windows to remove the im2row HBM roundtrip.
    x = jnp.transpose(x_nchw, (0, 2, 3, 1))                       # NHWC
    xp = jnp.pad(x, ((0, 0), (1, 1), (1, 1), (0, cin_p - cin)))
    xp = xp.astype(jnp.bfloat16)
    views = [xp[:, kh:kh + 2 * ho:2, kw:kw + 2 * wo:2, :]
             for kh in range(3) for kw in range(3)]
    patches = jnp.concatenate(views, axis=-1).reshape(n, hw, k_dim)
    if hw_p != hw:
        patches = jnp.pad(patches, ((0, 0), (0, hw_p - hw), (0, 0)))

    # weights: OIHW -> (9*Cin_p, Cout_p) bf16 (tap-major rows, matches patches)
    w_r = jnp.transpose(weight_oihw, (2, 3, 1, 0))                # (3,3,Cin,Cout)
    w_r = jnp.pad(w_r, ((0, 0), (0, 0), (0, cin_p - cin), (0, cout_p - cout)))
    w_r = w_r.reshape(k_dim, cout_p).astype(jnp.bfloat16)
    b_r = jnp.pad(bias, (0, cout_p - cout)).reshape(1, cout_p).astype(jnp.float32)

    cost = pl.CostEstimate(
        flops=2 * n * hw_p * k_dim * cout_p,
        transcendentals=0,
        bytes_accessed=(n * hw_p * k_dim * 2 + k_dim * cout_p * 2
                        + cout_p * 4 + n * hw_p * cout_p * 4))

    out = pl.pallas_call(
        _conv_ds_kernel,
        out_shape=jax.ShapeDtypeStruct((n, hw_p, cout_p), x_nchw.dtype),
        grid=(n, hw_p // thw),
        in_specs=[
            pl.BlockSpec((1, thw, k_dim), lambda b, t: (b, t, 0)),
            pl.BlockSpec((k_dim, cout_p), lambda b, t: (0, 0)),
            pl.BlockSpec((1, cout_p), lambda b, t: (0, 0)),
        ],
        out_specs=pl.BlockSpec((1, thw, cout_p), lambda b, t: (b, t, 0)),
        compiler_params=pltpu.CompilerParams(
            dimension_semantics=("parallel", "parallel"),
            vmem_limit_bytes=48 * 1024 * 1024),
        cost_estimate=cost,
    )(patches, w_r, b_r)

    out = out[:, :hw, :cout].reshape(n, ho, wo, cout)
    return jnp.transpose(out, (0, 3, 1, 2))   # back to NCHW


def downsample_avgpool(x_nchw):
    """avg_pool2d(k=2, stride=2).  x: (N, C, H, W) -> (N, C, H//2, W//2)."""
    n, c, h, w = x_nchw.shape
    ho, wo = h // 2, w // 2
    h2, w2 = 2 * ho, 2 * wo

    x = x_nchw[:, :, :h2, :w2]                 # floor-crop (no-op for even H/W)
    m = n * c * ho
    tm = min(1024, _round_up(m, 8))
    m_p = _round_up(m, tm)

    # free contiguous reshape: each row = the 2*W2 values of one 2-row window
    x3 = x.reshape(m, 2 * w2)
    if m_p != m:
        x3 = jnp.pad(x3, ((0, m_p - m), (0, 0)))

    # pooling matrix: flattened index k = dr*W2 + col contributes to out col//2
    k_idx = jnp.arange(2 * w2)
    pmat = (((k_idx % w2) // 2)[:, None] == jnp.arange(wo)[None, :])
    pmat = pmat.astype(x_nchw.dtype) * 0.25    # (2*W2, Wo)

    cost = pl.CostEstimate(
        flops=2 * m_p * 2 * w2 * wo,
        transcendentals=0,
        bytes_accessed=(m_p * 2 * w2 + 2 * w2 * wo + m_p * wo)
                       * x_nchw.dtype.itemsize)

    out = pl.pallas_call(
        _avgpool_ds_kernel,
        out_shape=jax.ShapeDtypeStruct((m_p, wo), x_nchw.dtype),
        grid=(m_p // tm,),
        in_specs=[
            pl.BlockSpec((tm, 2 * w2), lambda i: (i, 0)),
            pl.BlockSpec((2 * w2, wo), lambda i: (0, 0)),
        ],
        out_specs=pl.BlockSpec((tm, wo), lambda i: (i, 0)),
        compiler_params=pltpu.CompilerParams(
            dimension_semantics=("parallel",),
            vmem_limit_bytes=48 * 1024 * 1024),
        cost_estimate=cost,
    )(x3, pmat)

    return out[:m].reshape(n, c, ho, wo)


class Downsample:
    """JAX/Pallas port of nicediffusion Downsample (2x spatial downsampling)."""

    def __init__(self, in_channels, with_conv, out_channels=None, *, key):
        self.with_conv = with_conv
        if with_conv:
            oc = out_channels if out_channels is not None else in_channels
            k_w, k_b = jax.random.split(key)
            fan_in = in_channels * 3 * 3
            bound = 1.0 / math.sqrt(fan_in)
            self.weight = jax.random.uniform(
                k_w, (oc, in_channels, 3, 3), jnp.float32, -bound, bound)
            self.bias = jax.random.uniform(
                k_b, (oc,), jnp.float32, -bound, bound)

    def __call__(self, x):
        if self.with_conv:
            return downsample_conv(x, self.weight, self.bias)
        return downsample_avgpool(x)


# ----------------------------- main / check -------------------------------- #

if __name__ == "__main__":
    key = jax.random.PRNGKey(0)
    k_x, k_p = jax.random.split(key)
    x = jax.random.normal(k_x, (2, 4, 16, 16), jnp.float32)  # NCHW

    # conv path (bf16 operands, f32 accumulation -> loosened tolerance)
    mod_conv = Downsample(in_channels=4, with_conv=True, out_channels=4, key=k_p)
    y_conv = jax.block_until_ready(mod_conv(x))

    ref_conv = jax.lax.conv_general_dilated(
        x, mod_conv.weight, window_strides=(2, 2),
        padding=((1, 1), (1, 1)),
        dimension_numbers=("NCHW", "OIHW", "NCHW"),
    ) + mod_conv.bias[None, :, None, None]

    assert y_conv.shape == (2, 4, 8, 8)
    assert jnp.allclose(y_conv, ref_conv, atol=5e-2, rtol=5e-2)

    # avg-pool path (MXU matmul at default f32 precision -> loose tolerance)
    mod_pool = Downsample(in_channels=4, with_conv=False, key=k_p)
    y_pool = jax.block_until_ready(mod_pool(x))

    ref_pool = x.reshape(2, 4, 8, 2, 8, 2).mean(axis=(3, 5))
    assert y_pool.shape == (2, 4, 8, 8)
    assert jnp.allclose(y_pool, ref_pool, atol=2e-2, rtol=2e-2)

    print("KERNEL_OK")
</pallas_src>

<mosaic_0001>
module attributes {stable_mosaic.version = 11 : i64} {
  func.func @_conv_ds_kernel(%arg0: i32, %arg1: i32, %arg2: memref<1x64x1152xbf16, #tpu.memory_space<vmem>>, %arg3: memref<1152x128xbf16, #tpu.memory_space<vmem>>, %arg4: memref<1x128xf32, #tpu.memory_space<vmem>>, %arg5: memref<1x64x128xf32, #tpu.memory_space<vmem>>) attributes {dimension_semantics = [#tpu.dimension_semantics<parallel>, #tpu.dimension_semantics<parallel>], iteration_bounds = array<i64: 2, 1>, scalar_prefetch = 0 : i64, scratch_operands = 0 : i64, tpu.core_type = #tpu.core_type<tc>, window_params = [{transform_indices = @transform_0, window_bounds = array<i64: 1, 64, 1152>}, {pipeline_mode = #tpu.pipeline_mode<synchronous>, transform_indices = @transform_1, window_bounds = array<i64: 1152, 128>}, {pipeline_mode = #tpu.pipeline_mode<synchronous>, transform_indices = @transform_2, window_bounds = array<i64: 1, 128>}, {transform_indices = @transform_3, window_bounds = array<i64: 1, 64, 128>}]} {
    %c0 = arith.constant 0 : index
    %c0_0 = arith.constant 0 : index
    %c0_1 = arith.constant 0 : index
    %0 = vector.load %arg2[%c0, %c0_0, %c0_1] : memref<1x64x1152xbf16, #tpu.memory_space<vmem>>, vector<1x64x1152xbf16>
    %1 = vector.shape_cast %0 : vector<1x64x1152xbf16> to vector<64x1152xbf16>
    %c0_2 = arith.constant 0 : index
    %c0_3 = arith.constant 0 : index
    %2 = vector.load %arg3[%c0_2, %c0_3] : memref<1152x128xbf16, #tpu.memory_space<vmem>>, vector<1152x128xbf16>
    %cst = arith.constant dense<0.000000e+00> : vector<64x128xf32>
    %3 = tpu.matmul %1, %2, %cst {dimension_numbers = #tpu.dot_dimension_numbers<[1], [0], [0], [1], [0, 0, 1, 1], [], []>} : vector<64x1152xbf16>, vector<1152x128xbf16>, vector<64x128xf32> -> vector<64x128xf32>
    %c0_4 = arith.constant 0 : index
    %c0_5 = arith.constant 0 : index
    %4 = vector.load %arg4[%c0_4, %c0_5] : memref<1x128xf32, #tpu.memory_space<vmem>>, vector<1x128xf32>
    %5 = vector.broadcast %4 : vector<1x128xf32> to vector<64x128xf32>
    %6 = arith.addf %3, %5 : vector<64x128xf32>
    %c0_6 = arith.constant 0 : index
    %c0_7 = arith.constant 0 : index
    %c0_8 = arith.constant 0 : index
    %7 = vector.load %arg5[%c0_6, %c0_7, %c0_8] : memref<1x64x128xf32, #tpu.memory_space<vmem>>, vector<1x64x128xf32>
    %8 = vector.shape_cast %7 : vector<1x64x128xf32> to vector<64x128xf32>
    %9 = vector.shape_cast %6 : vector<64x128xf32> to vector<1x64x128xf32>
    tpu.vector_store %arg5[%c0_6, %c0_7, %c0_8], %9 {strides = array<i32>} : memref<1x64x128xf32, #tpu.memory_space<vmem>>, vector<1x64x128xf32>,
    return
  }
  func.func @transform_0(%arg0: i32, %arg1: i32) -> (i32, i32, i32) {
    %c0_i32 = arith.constant 0 : i32
    %c0_i32_0 = arith.constant 0 : i32
    return %arg0, %arg1, %c0_i32 : i32, i32, i32
  }
  func.func @transform_1(%arg0: i32, %arg1: i32) -> (i32, i32) {
    %c0_i32 = arith.constant 0 : i32
    %c0_i32_0 = arith.constant 0 : i32
    %c0_i32_1 = arith.constant 0 : i32
    return %c0_i32, %c0_i32_0 : i32, i32
  }
  func.func @transform_2(%arg0: i32, %arg1: i32) -> (i32, i32) {
    %c0_i32 = arith.constant 0 : i32
    %c0_i32_0 = arith.constant 0 : i32
    %c0_i32_1 = arith.constant 0 : i32
    return %c0_i32, %c0_i32_0 : i32, i32
  }
  func.func @transform_3(%arg0: i32, %arg1: i32) -> (i32, i32, i32) {
    %c0_i32 = arith.constant 0 : i32
    %c0_i32_0 = arith.constant 0 : i32
    return %arg0, %arg1, %c0_i32 : i32, i32, i32
  }
}

</mosaic_0001>

<bundles_post_ra>
// kernel: tpu_custom_call.1
= control target key start
LH: loop header
LB: loop body
LE: loop exit
PB: predicated region body
PF: predicated region fallthrough
CT: control target
= control target key end

     0   :  { %8 = vsyncpa [#allocation3], 0  ;;  %s2526_s0 = inlined_call_operand.hbm [shape: bf16[2,64,1152], index: 0, kind: input, shape index: {}]   ;;  %s2527_s1 = inlined_call_operand.hbm [shape: bf16[1152,128], index: 1, kind: input, shape index: {}]   ;;  %s2528_s2 = inlined_call_operand.vmem [shape: f32[1,128], index: 2, kind: input, shape index: {}]   ;;  %s2529_s3 = inlined_call_operand.hbm [shape: f32[2,64,128], index: 3, kind: output, shape index: {}]  }
   0x1   :  { %10 = vsyncpa [#allocation3 + $0x1], 0 }
   0x2   :  { %11 = vsyncpa [#allocation6], 0 }
   0x3   :  { %12 = vsyncpa [#allocation4], 0 }
   0x4   :  { %14 = vsyncpa [#allocation4 + $0x1], 0  ;;  %s2246_s12 = smov 0   ;;  %s2248_s13 = smov 0  }
   0x5   :  { %s2250_s14 = smov 0   ;;  %s2252_s15 = smov 0  }
   0x6   :  { %s2254_s16 = smov 0   ;;  %s2256_s17 = smov 0  }
   0x7 LB: > { %s1417_s18 = sadd.s32 4294967295, %s2217_s17   ;;  %s1418_s19 = sadd.s32 4294967294, %s2217_s17   ;;  %s2217_s17 = sphi %s2256_s17, %s20_s17   ;;  %s2213_s16 = sphi %s2254_s16, %s2540_s16   ;;  %s2209_s15 = sphi %s2252_s15, %s2539_s15   ;;  %s2205_s14 = sphi %s2250_s14, %s2538_s14   ;;  %s2201_s13 = sphi %s2248_s13, %s2537_s13   ;;  %s2197_s12 = sphi %s2246_s12, %s2536_s12  }
   0x8   : > { %p54_p0 = scmp.ne.s32.totalorder %s2201_s13, %s2197_s12  ;;  %p2280_p1 = scmp.eq.s32.totalorder %s1417_s18, 0 }
   0x9   : > { %p2284_p2 = scmp.eq.s32.totalorder %s1417_s18, 1  ;;  %p128_p3 = scmp.eq.s32.totalorder %s1418_s19, 1 }
   0xa   : > { %p2290_p4 = por %p2280_p1, %p54_p0  ;;  %p1419_p5 = scmp.ge.s32.totalorder %s2217_s17, 1 }
   0xb   : > { %p2295_p6 = por %p128_p3, %p54_p0  ;;  %p135_p7 = scmp.lt.s32.totalorder %s2217_s17, 3 }
   0xc   : > { %s146_s26 = sshll.u32 %s2527_s1, 4  ;;  %s2219_s28 = smov [#allocation5]   ;;  %s147_s26 = int_to_ptr.hbm [resolvable:$true] %s146_s26 }
   0xd   : > { %p2303_p8 = pnand %p1419_p5, %p135_p7  ;;  %s148_s29 = sshll.u32 %s2219_s28, 4  ;;  %s149_s29 = int_to_ptr.vmem [resolvable:$true] %s148_s29 }
   0xe   : > { %p1421_p11 = scmp.ge.s32.totalorder %s2217_s17, 2  ;;  %s2220_s30 = smov 64  }
   0xf   : > { %p1999_p9 = pneg %p2303_p8  ;;  %s2221_s4 = smov 4  }
  0x10   : > { %s32_s5 = sadd.s32 1, %s2213_s16  ;;  %s41_s6 = sadd.s32 1, %s2205_s14 }
  0x11   : > { %p2000_p10 = pnand %p1999_p9, %p2280_p1  ;;  %p34_p12 = scmp.ge.s32.totalorder %s32_s5, 2 }
  0x12   : > { %p48_p13 = scmp.ne.s32.totalorder %s2205_s14, %s2201_s13  ;;  %p49_p0 = scmp.eq.s32.totalorder %s2217_s17, 0 }
  0x13   : > { %2002 = dma.hbm_to_vmem [thread:$0]  (!%p2000_p10), %s147_s26, 9216, %s149_s29, [#allocation6], %s2220_s30, %s2220_s30, %s2221_s4  }
  0x14   : > { %s2542_s5 = smov (%p34_p12, %s32_s5), 0  ;;  %p50_p3 = por %p49_p0, %p48_p13 }
  0x15   : > { %p2321_p5 = por %p2284_p2, %p48_p13  ;;  %s36_s8 = ssub.s32 %s2213_s16, %s2542_s5 }
  0x16   : > { %p2012_p7 = scmp.lt.s32.totalorder %s2217_s17, 2  ;;  %p39_p9 = scmp.eq.s32.totalorder %s36_s8, 0 }
  0x17   : > { %s165_s9 = sand.u32 1, %s2205_s14   ;;  %s1989_s18 = smul.u32 288, %s2213_s16 }
  0x18   : > { %s1988_s10 = smul.u32 288, %s165_s9  ;;  %p2004_p10 = pnand %p2012_p7, %p50_p3 }
  0x19   : > { %s2330_s11 = scalar_select %p39_p9, %s2205_s14, %s41_s6  }
  0x1a   : > { %s169_s19 = scalar_lea.vmem [#allocation2], %s1988_s10  ;;  %s177_s28 = scalar_lea.hbm %s2526_s0, %s1989_s18 }
  0x1b   : > { %s180_s24 = sshll.u32 %s169_s19, 4  ;;  %s178_s21 = sshll.u32 %s177_s28, 4  ;;  %s181_s24 = int_to_ptr.vmem [resolvable:$true] %s180_s24  ;;  %s179_s21 = int_to_ptr.hbm [resolvable:$true] %s178_s21 }
  0x1c   : > { %s166_s29 = scalar_lea.sflag [#allocation3], %s165_s9  ;;  %s2222_s30 = smov 576  }
  0x1d   : > { %s2223_s4 = smov 36   ;;  %192 = sbr.rel (%p2303_p8) target bundleno = 360 (0x168), region = 32 }
  0x1e   : > { %2006 = dma.hbm_to_vmem [thread:$0]  (!%p2004_p10), %s179_s21, 4608, %s181_s24, %s166_s29, %s2222_s30, %s2222_s30, %s2223_s4  }
  0x1f   : > { %s2339_s6 = sand.u32 (!%p2303_p8), 1, %s2201_s13  }
  0x20   : > { %s1990_s8 = smul.u32 (!%p2303_p8), 288, %s2339_s6  ;;  %s195_s10 = scalar_lea.sflag (!%p2303_p8), [#allocation3], %s2339_s6 }
  0x22   : > { %s2343_s19 = scalar_lea.vmem [#allocation2], %s1990_s8 }
  0x23   : > { %2184 = dma.done.wait (%p2290_p4), %s195_s10, 4608  }
  0x24   : > { %2186 = vsyncadd (%p2290_p4), %s195_s10, 4294962688 }
  0x25   : > { %2188 = dma.done.wait (%p2280_p1), [#allocation6], 9216  }
  0x26   : > { %2190 = vsyncadd (%p2280_p1), [#allocation6], 4294958080  ;;  %v1906_v0 = vld [vmem:[#allocation5 + $0x38] sm:$0xff]  ;;  %v1905_v2 = vld [vmem:[#allocation5 + $0x30] sm:$0xff]  ;;  %s1425_s27 = sshll.u32 %s2339_s6, 6  ;;  %s1971_s18 = sshll.u32 %s2209_s15, 6 }
  0x27   : > { %v1922_v1 = vld [vmem:[#allocation5 + $0xb8] sm:$0xff]  ;;  %1972 = vmatpush.bf16.msra.mxu1 %v1906_v0  ;;  %1033 = vmatpush.bf16.msra.mxu0 %v1906_v0  ;;  %v1921_v3 = vld [vmem:[#allocation5 + $0xb0] sm:$0xff]  ;;  %v1904_v6 = vld [vmem:[#allocation5 + $0x28] sm:$0xff]  ;;  %s2463_s9 = scalar_lea.vmem [#allocation7], %s1425_s27  ;;  %s1316_s26 = scalar_lea.hbm %s2529_s3, %s1971_s18 }
  0x28   : > { %1091 = vmatpush.bf16.msra.mxu2 %v1922_v1  ;;  %v1930_v4 = vld [vmem:[#allocation5 + $0xf8] sm:$0xff]  ;;  %v1929_v5 = vld [vmem:[#allocation5 + $0xf0] sm:$0xff]  ;;  %v1920_v7 = vld [vmem:[#allocation5 + $0xa8] sm:$0xff]  ;;  %s1317_s28 = sshll.u32 %s2463_s9, 4  ;;  %s1319_s21 = sshll.u32 %s1316_s26, 4  ;;  %s1318_s28 = int_to_ptr.vmem [resolvable:$true] %s1317_s28  ;;  %s1320_s21 = int_to_ptr.hbm [resolvable:$true] %s1319_s21 }
  0x29   : > { %1120 = vmatpush.bf16.msra.mxu3 %v1930_v4  ;;  %v1928_v8 = vld [vmem:[#allocation5 + $0xe8] sm:$0xff]  ;;  %v1903_v9 = vld [vmem:[#allocation5 + $0x20] sm:$0xff]  ;;  %v1902_v12 = vld [vmem:[#allocation5 + $0x18] sm:$0xff]  ;;  %s1303_s15 = scalar_lea.sflag [#allocation4], %s2339_s6  ;;  %s2145_s29 = sshra.s32 %s1320_s21, 4  ;;  %s2146_s29 = int_to_ptr.hbm [resolvable:$true] %s2145_s29 }
  0x2a   : > { %v1919_v10 = vld [vmem:[#allocation5 + $0xa0] sm:$0xff]  ;;  %v1918_v13 = vld [vmem:[#allocation5 + $0x98] sm:$0xff]  ;;  %v1901_v15 = vld [vmem:[#allocation5 + $0x10] sm:$0xff]  ;;  %s2147_s30 = scalar_lea.hbm %s2146_s29, 64  ;;  %s2151_s10 = scalar_lea.hbm %s2529_s3, 128 }
  0x2b   : > { %1973 = vmatpush.bf16.msra.mxu1 %v1905_v2  ;;  %1034 = vmatpush.bf16.msra.mxu0 %v1905_v2  ;;  %v1927_v11 = vld [vmem:[#allocation5 + $0xe0] sm:$0xff]  ;;  %v1926_v14 = vld [vmem:[#allocation5 + $0xd8] sm:$0xff]  ;;  %v1917_v16 = vld [vmem:[#allocation5 + $0x90] sm:$0xff]  ;;  %p2148_p1 = scmp.ne.s32.totalorder %s2146_s29, %s2147_s30  ;;  %p2152_p8 = scmp.lt.s32.totalorder %s2146_s29, %s2529_s3 }
  0x2c   : > { %1092 = vmatpush.bf16.msra.mxu2 %v1921_v3  ;;  %v1925_v17 = vld [vmem:[#allocation5 + $0xd0] sm:$0xff]  ;;  %v1900_v18 = vld [vmem:[#allocation5 + $0x8] sm:$0xff]  ;;  %v1899_v20 = vld [vmem:[#allocation5] sm:$0xff]  ;;  %p2153_p12 = scmp.lt.s32.totalorder %s2151_s10, %s2147_s30 }
  0x2d   : > { %1121 = vmatpush.bf16.msra.mxu3 %v1929_v5  ;;  %v1916_v19 = vld [vmem:[#allocation5 + $0x88] sm:$0xff]  ;;  %v1500_v21 = vld [vmem:[%s2343_s19 + $0x90] sm:$0xf]  ;;  %v1885_v22 = vld [vmem:[%s2343_s19 + $0xb0] sm:$0xf0]  ;;  %p2149_p2 = pnand %p2148_p1, %p2321_p5 }
  0x2e   : > { %v1924_v23 = vld [vmem:[#allocation5 + $0xc8] sm:$0xff]  ;;  %v1914_v24 = vld [vmem:[#allocation5 + $0x78] sm:$0xff]  ;;  %v1428_v25 = vld [vmem:[%s2343_s19] sm:$0xf]  ;;  %v1501_v32 = vor.u32 %v1885_v22, %v1500_v21  ;;  %p2154_p13 = por %p2153_p12, %p2152_p8 }
  0x2f   : > { %1974 = vmatpush.bf16.msra.mxu1 %v1904_v6  ;;  %1035 = vmatpush.bf16.msra.mxu0 %v1904_v6  ;;  %v1867_v26 = vld [vmem:[%s2343_s19 + $0x20] sm:$0xf0]  ;;  %v1436_v28 = vld [vmem:[%s2343_s19 + $0x8] sm:$0xf]  ;;  %v1868_v29 = vld [vmem:[%s2343_s19 + $0x28] sm:$0xf0]  ;;  %p2150_p4 = pneg %p2149_p2 }
  0x30   : > { %1093 = vmatpush.bf16.msra.mxu2 %v1920_v7  ;;  %v1915_v27 = vld [vmem:[#allocation5 + $0x80] sm:$0xff]  ;;  %v1938_v30 = vld [vmem:[#allocation5 + $0x138] sm:$0xff]  ;;  %v1429_v33 = vor.u32 %v1867_v26, %v1428_v25  ;;  %v1437_v34 = vor.u32 %v1868_v29, %v1436_v28  ;;  %v1864_v36 = vld [vmem:[%s2343_s19 + $0xc] sm:$0xf] }
  0x31   : > { %1122 = vmatpush.bf16.msra.mxu3 %v1928_v8  ;;  %v1954_v31 = vld [vmem:[#allocation5 + $0x1b8] sm:$0xff]  ;;  %v1923_v35 = vld [vmem:[#allocation5 + $0xc0] sm:$0xff]  ;;  %v1438_v37 = vld [vmem:[%s2343_s19 + $0x2c] sm:$0xf0]  ;;  %p2155_p0 = pnand %p2154_p13, %p2150_p4 }
  0x32   : > { %v1913_v38 = vld [vmem:[#allocation5 + $0x70] sm:$0xff]  ;;  %v1962_v39 = vld [vmem:[#allocation5 + $0x1f8] sm:$0xff]  ;;  %v1441_v42 = vor.u32 %v1864_v36, %v1438_v37  ;;  %v1912_v43 = vld [vmem:[#allocation5 + $0x68] sm:$0xff] }
  0x33   : > { %1975 = vmatpush.bf16.msra.mxu1 %v1903_v9  ;;  %1036 = vmatpush.bf16.msra.mxu0 %v1903_v9  ;;  %v1937_v40 = vld [vmem:[#allocation5 + $0x130] sm:$0xff]  ;;  %v1936_v45 = vld [vmem:[#allocation5 + $0x128] sm:$0xff]  ;;  %v1911_v47 = vld [vmem:[#allocation5 + $0x60] sm:$0xff] }
  0x34   : > { %1094 = vmatpush.bf16.msra.mxu2 %v1919_v10  ;;  %v1953_v41 = vld [vmem:[#allocation5 + $0x1b0] sm:$0xff]  ;;  %v1952_v46 = vld [vmem:[#allocation5 + $0x1a8] sm:$0xff]  ;;  %v1935_v49 = vld [vmem:[#allocation5 + $0x120] sm:$0xff] }
  0x35   : > { %1123 = vmatpush.bf16.msra.mxu3 %v1927_v11  ;;  %v1961_v44 = vld [vmem:[#allocation5 + $0x1f0] sm:$0xff]  ;;  %v1960_v48 = vld [vmem:[#allocation5 + $0x1e8] sm:$0xff]  ;;  %v1951_v50 = vld [vmem:[#allocation5 + $0x1a0] sm:$0xff] }
  0x36   : > { %v1536_v51 = vld [vmem:[%s2343_s19 + $0xd8] sm:$0xf]  ;;  %v1894_v52 = vld [vmem:[%s2343_s19 + $0xf8] sm:$0xf0]  ;;  %v1464_v53 = vld [vmem:[%s2343_s19 + $0x48] sm:$0xf] }
  0x37   : > { %1976 = vmatpush.bf16.msra.mxu1 %v1902_v12  ;;  %1037 = vmatpush.bf16.msra.mxu0 %v1902_v12  ;;  %v1876_v54 = vld [vmem:[%s2343_s19 + $0x68] sm:$0xf0]  ;;  %v1910_v55 = vld [vmem:[#allocation5 + $0x58] sm:$0xff]  ;;  %v1472_v56 = vld [vmem:[%s2343_s19 + $0x50] sm:$0xf]  ;;  %v1537_v59 = vor.u32 %v1894_v52, %v1536_v51 }
  0x38   : > { %1095 = vmatpush.bf16.msra.mxu2 %v1918_v13  ;;  %v1877_v57 = vld [vmem:[%s2343_s19 + $0x70] sm:$0xf0]  ;;  %v1934_v58 = vld [vmem:[#allocation5 + $0x118] sm:$0xff]  ;;  %v1465_v60 = vor.u32 %v1876_v54, %v1464_v53  ;;  %v1908_v4 = vld [vmem:[#allocation5 + $0x48] sm:$0xff] }
  0x39   : > { %1124 = vmatpush.bf16.msra.mxu3 %v1926_v14  ;;  %v1473_v61 = vor.u32 %v1877_v57, %v1472_v56  ;;  %v1873_v62 = vld [vmem:[%s2343_s19 + $0x54] sm:$0xf]  ;;  %v1474_v63 = vld [vmem:[%s2343_s19 + $0x74] sm:$0xf0]  ;;  %v1959_v5 = vld [vmem:[#allocation5 + $0x1e0] sm:$0xff] }
  0x3a   : > { %v1909_v0 = vld [vmem:[#allocation5 + $0x50] sm:$0xff]  ;;  %v1477_v2 = vor.u32 %v1873_v62, %v1474_v63  ;;  %v1950_v3 = vld [vmem:[#allocation5 + $0x198] sm:$0xff]  ;;  %v1932_v6 = vld [vmem:[#allocation5 + $0x108] sm:$0xff] }
  0x3b   : > { %1977 = vmatpush.bf16.msra.mxu1 %v1901_v15  ;;  %1038 = vmatpush.bf16.msra.mxu0 %v1901_v15  ;;  %v1933_v1 = vld [vmem:[#allocation5 + $0x110] sm:$0xff]  ;;  %v1958_v8 = vld [vmem:[#allocation5 + $0x1d8] sm:$0xff]  ;;  %v1907_v9 = vld [vmem:[#allocation5 + $0x40] sm:$0xff] }
  0x3c   : > { %1096 = vmatpush.bf16.msra.mxu2 %v1917_v16  ;;  %v1949_v7 = vld [vmem:[#allocation5 + $0x190] sm:$0xff]  ;;  %v1946_v10 = vld [vmem:[#allocation5 + $0x178] sm:$0xff]  ;;  %v1931_v11 = vld [vmem:[#allocation5 + $0x100] sm:$0xff] }
  0x3d   : > { %1125 = vmatpush.bf16.msra.mxu3 %v1925_v17  ;;  %v1863_v12 = vld [vmem:[%s2343_s19 + $0x4] sm:$0xf]  ;;  %v1970_v13 = vld [vmem:[#allocation5 + $0x238] sm:$0xff]  ;;  %v1430_v14 = vld [vmem:[%s2343_s19 + $0x24] sm:$0xf0] }
  0x3e   : > { %v1444_v15 = vld [vmem:[%s2343_s19 + $0x10] sm:$0xf]  ;;  %v1869_v16 = vld [vmem:[%s2343_s19 + $0x30] sm:$0xf0]  ;;  %v1508_v17 = vld [vmem:[%s2343_s19 + $0x98] sm:$0xf] }
  0x3f   : > { %1978 = vmatpush.bf16.msra.mxu1 %v1900_v18  ;;  %1039 = vmatpush.bf16.msra.mxu0 %v1900_v18  ;;  %v1886_v18 = vld [vmem:[%s2343_s19 + $0xb8] sm:$0xf0]  ;;  %v1445_v21 = vor.u32 %v1869_v16, %v1444_v15  ;;  %v1969_v25 = vld [vmem:[#allocation5 + $0x230] sm:$0xff]  ;;  %v1944_v26 = vld [vmem:[#allocation5 + $0x168] sm:$0xff] }
  0x40   : > { %1097 = vmatpush.bf16.msra.mxu2 %v1916_v19  ;;  %v1945_v19 = vld [vmem:[#allocation5 + $0x170] sm:$0xff]  ;;  %v1509_v22 = vor.u32 %v1886_v18, %v1508_v17  ;;  %v1947_v29 = vld [vmem:[#allocation5 + $0x180] sm:$0xff]  ;;  %v1872_v36 = vld [vmem:[%s2343_s19 + $0x4c] sm:$0xf] }
  0x41   : > { %1126 = vmatpush.bf16.msra.mxu3 %v1924_v23  ;;  %v1882_v23 = vld [vmem:[%s2343_s19 + $0x9c] sm:$0xf]  ;;  %v1466_v37 = vld [vmem:[%s2343_s19 + $0x6c] sm:$0xf0]  ;;  %v1939_v52 = vld [vmem:[#allocation5 + $0x140] sm:$0xff] }
  0x42   : > { %v1966_v51 = vld [vmem:[#allocation5 + $0x218] sm:$0xff]  ;;  %v1965_v53 = vld [vmem:[#allocation5 + $0x210] sm:$0xff]  ;;  %v1516_v57 = vld [vmem:[%s2343_s19 + $0xa0] sm:$0xf] }
  0x43   : > { %1979 = vmatpush.bf16.msra.mxu1 %v1899_v20  ;;  %1040 = vmatpush.bf16.msra.mxu0 %v1899_v20  ;;  %v1433_v20 = vor.u32 %v1863_v12, %v1430_v14  ;;  %v1881_v54 = vld [vmem:[%s2343_s19 + $0x94] sm:$0xf]  ;;  %v1502_v56 = vld [vmem:[%s2343_s19 + $0xb4] sm:$0xf0]  ;;  %v1490_v14 = vld [vmem:[%s2343_s19 + $0x84] sm:$0xf0] }
  0x44   : > { %1098 = vmatpush.bf16.msra.mxu2 %v1915_v27  ;;  %v1948_v27 = vld [vmem:[#allocation5 + $0x188] sm:$0xff]  ;;  %v1865_v16 = vld [vmem:[%s2343_s19 + $0x14] sm:$0xf]  ;;  %v1446_v17 = vld [vmem:[%s2343_s19 + $0x34] sm:$0xf0] }
  0x45   : > { %1127 = vmatpush.bf16.msra.mxu3 %v1923_v35  ;;  %v1942_v35 = vld [vmem:[#allocation5 + $0x158] sm:$0xff]  ;;  %v1460_v18 = vld [vmem:[%s2343_s19 + $0x20] sm:$0xf] }
  0x46   : > { %1051 = vmatmul.bf16.vlgmr.msra.gmra.mxu1 %v1501_v32  ;;  %1041 = vmatmul.bf16.vlgmr.msra.gmra.mxu0 %v1429_v33  ;;  %v1943_v32 = vld [vmem:[#allocation5 + $0x160] sm:$0xff]  ;;  %v1956_v33 = vld [vmem:[#allocation5 + $0x1c8] sm:$0xff] }
  0x47   : > { %1062 = vmatpush.bf16.msrb.mxu1 %v1914_v24  ;;  %1149 = vmatpush.bf16.msrb.mxu0 %v1938_v30  ;;  %v1510_v24 = vld [vmem:[%s2343_s19 + $0xbc] sm:$0xf0]  ;;  %v1957_v30 = vld [vmem:[#allocation5 + $0x1d0] sm:$0xff] }
  0x48   : > { %1207 = vmatpush.bf16.msrb.mxu2 %v1954_v31  ;;  %1128 = vmatmul.bf16.vlgmr.msra.gmra.mxu3 %v1441_v42  ;;  %v1513_v28 = vor.u32 %v1882_v23, %v1510_v24  ;;  %v1968_v31 = vld [vmem:[#allocation5 + $0x228] sm:$0xff]  ;;  %v1941_v42 = vld [vmem:[#allocation5 + $0x150] sm:$0xff] }
  0x49   : > { %1099 = vmatmul.bf16.vlgmr.msra.gmra.mxu2 %v1437_v34  ;;  %1236 = vmatpush.bf16.msrb.mxu3 %v1962_v39  ;;  %v1967_v34 = vld [vmem:[#allocation5 + $0x220] sm:$0xff]  ;;  %v1878_v39 = vld [vmem:[%s2343_s19 + $0x78] sm:$0xf0] }
  0x4b   : > { %1063 = vmatpush.bf16.msrb.mxu1 %v1913_v38  ;;  %1150 = vmatpush.bf16.msrb.mxu0 %v1937_v40  ;;  %v1480_v38 = vld [vmem:[%s2343_s19 + $0x58] sm:$0xf]  ;;  %v1544_v40 = vld [vmem:[%s2343_s19 + $0xe0] sm:$0xf] }
  0x4c   : > { %1208 = vmatpush.bf16.msrb.mxu2 %v1953_v41  ;;  %v1895_v41 = vld [vmem:[%s2343_s19 + $0x100] sm:$0xf0] }
  0x4d   : > { %1237 = vmatpush.bf16.msrb.mxu3 %v1961_v44  ;;  %v1481_v44 = vor.u32 %v1878_v39, %v1480_v38  ;;  %v1562_v38 = vld [vmem:[%s2343_s19 + $0x114] sm:$0xf0] }
  0x4f   : > { %1064 = vmatpush.bf16.msrb.mxu1 %v1912_v43  ;;  %1151 = vmatpush.bf16.msrb.mxu0 %v1936_v45  ;;  %v1469_v43 = vor.u32 %v1872_v36, %v1466_v37  ;;  %v1545_v45 = vor.u32 %v1895_v41, %v1544_v40  ;;  %v1893_v37 = vld [vmem:[%s2343_s19 + $0xf4] sm:$0xf]  ;;  %v1883_v40 = vld [vmem:[%s2343_s19 + $0xa4] sm:$0xf]  ;;  %v1518_v41 = vld [vmem:[%s2343_s19 + $0xc4] sm:$0xf0] }
  0x50   : > { %1209 = vmatpush.bf16.msrb.mxu2 %v1952_v46  ;;  %v1891_v46 = vld [vmem:[%s2343_s19 + $0xe4] sm:$0xf]  ;;  %v1565_v39 = vor.u32 %v1893_v37, %v1562_v38 }
  0x51   : > { %1238 = vmatpush.bf16.msrb.mxu3 %v1960_v48 }
  0x53   : > { %1065 = vmatpush.bf16.msrb.mxu1 %v1911_v47  ;;  %1152 = vmatpush.bf16.msrb.mxu0 %v1935_v49  ;;  %v1546_v47 = vld [vmem:[%s2343_s19 + $0x104] sm:$0xf0] }
  0x54   : > { %1210 = vmatpush.bf16.msrb.mxu2 %v1951_v50  ;;  %v1549_v48 = vor.u32 %v1891_v46, %v1546_v47  ;;  %v1940_v49 = vld [vmem:[#allocation5 + $0x148] sm:$0xff]  ;;  %v1955_v50 = vld [vmem:[#allocation5 + $0x1c0] sm:$0xff]  ;;  %v1521_v46 = vor.u32 %v1883_v40, %v1518_v41 }
  0x55   : > { %1239 = vmatpush.bf16.msrb.mxu3 %v1959_v5  ;;  %v1538_v5 = vld [vmem:[%s2343_s19 + $0xfc] sm:$0xf0] }
  0x56   : > { %1056 = vmatmul.bf16.gmra.mxu1 %v1537_v59  ;;  %1046 = vmatmul.bf16.gmra.mxu0 %v1465_v60  ;;  %v1452_v59 = vld [vmem:[%s2343_s19 + $0x18] sm:$0xf]  ;;  %v1870_v60 = vld [vmem:[%s2343_s19 + $0x38] sm:$0xf0] }
  0x57   : > { %1066 = vmatpush.bf16.msrb.mxu1 %v1910_v55  ;;  %1153 = vmatpush.bf16.msrb.mxu0 %v1934_v58  ;;  %v1964_v55 = vld [vmem:[#allocation5 + $0x208] sm:$0xff]  ;;  %v1887_v58 = vld [vmem:[%s2343_s19 + $0xc0] sm:$0xf0]  ;;  %v1453_v63 = vor.u32 %v1870_v60, %v1452_v59 }
  0x58   : > { %1211 = vmatpush.bf16.msrb.mxu2 %v1950_v3  ;;  %1133 = vmatmul.bf16.gmra.mxu3 %v1477_v2  ;;  %v1517_v62 = vor.u32 %v1887_v58, %v1516_v57  ;;  %v1963_v3 = vld [vmem:[#allocation5 + $0x200] sm:$0xff] }
  0x59   : > { %1104 = vmatmul.bf16.gmra.mxu2 %v1473_v61  ;;  %1240 = vmatpush.bf16.msrb.mxu3 %v1958_v8  ;;  %v1505_v61 = vor.u32 %v1881_v54, %v1502_v56  ;;  %v1488_v8 = vld [vmem:[%s2343_s19 + $0x60] sm:$0xf]  ;;  %v1554_v56 = vld [vmem:[%s2343_s19 + $0x10c] sm:$0xf0] }
  0x5b   : > { %1067 = vmatpush.bf16.msrb.mxu1 %v1909_v0  ;;  %1154 = vmatpush.bf16.msrb.mxu0 %v1933_v1  ;;  %v1866_v0 = vld [vmem:[%s2343_s19 + $0x1c] sm:$0xf]  ;;  %v1454_v1 = vld [vmem:[%s2343_s19 + $0x3c] sm:$0xf0] }
  0x5c   : > { %1212 = vmatpush.bf16.msrb.mxu2 %v1949_v7  ;;  %v1457_v2 = vor.u32 %v1866_v0, %v1454_v1  ;;  %v1896_v7 = vld [vmem:[%s2343_s19 + $0x108] sm:$0xf0] }
  0x5d   : > { %1241 = vmatpush.bf16.msrb.mxu3 %v1957_v30  ;;  %v1496_v30 = vld [vmem:[%s2343_s19 + $0x68] sm:$0xf] }
  0x5f   : > { %1068 = vmatpush.bf16.msrb.mxu1 %v1908_v4  ;;  %1155 = vmatpush.bf16.msrb.mxu0 %v1932_v6  ;;  %v1890_v4 = vld [vmem:[%s2343_s19 + $0xdc] sm:$0xf]  ;;  %v1552_v6 = vld [vmem:[%s2343_s19 + $0xe8] sm:$0xf] }
  0x60   : > { %1213 = vmatpush.bf16.msrb.mxu2 %v1948_v27 }
  0x61   : > { %1242 = vmatpush.bf16.msrb.mxu3 %v1956_v33  ;;  %v1897_v33 = vld [vmem:[%s2343_s19 + $0x110] sm:$0xf0] }
  0x63   : > { %1069 = vmatpush.bf16.msrb.mxu1 %v1907_v9  ;;  %1156 = vmatpush.bf16.msrb.mxu0 %v1931_v11  ;;  %v1879_v9 = vld [vmem:[%s2343_s19 + $0x80] sm:$0xf0]  ;;  %v1553_v11 = vor.u32 %v1896_v7, %v1552_v6 }
  0x64   : > { %1214 = vmatpush.bf16.msrb.mxu2 %v1947_v29  ;;  %v1489_v12 = vor.u32 %v1879_v9, %v1488_v8  ;;  %v1482_v29 = vld [vmem:[%s2343_s19 + $0x7c] sm:$0xf0] }
  0x65   : > { %1243 = vmatpush.bf16.msrb.mxu3 %v1955_v50 }
  0x66   : > { %1070 = vmatmul.bf16.vlgmr.msrb.gmra.mxu1 %v1433_v20  ;;  %1157 = vmatmul.bf16.vlgmr.msrb.gmra.mxu0 %v1445_v21  ;;  %v1524_v20 = vld [vmem:[%s2343_s19 + $0xa8] sm:$0xf]  ;;  %v1888_v21 = vld [vmem:[%s2343_s19 + $0xc8] sm:$0xf0] }
  0x67   : > { %1178 = vmatpush.bf16.msra.mxu1 %v1946_v10  ;;  %1265 = vmatpush.bf16.msra.mxu0 %v1970_v13  ;;  %v1541_v10 = vor.u32 %v1890_v4, %v1538_v5  ;;  %v1525_v24 = vor.u32 %v1888_v21, %v1524_v20 }
  0x68   : > { %1138 = vmatmul.bf16.gmra.mxu3 %v1513_v28  ;;  %1980 = vmatpush.bf16.msra.mxu2 %v1970_v13  ;;  %v1875_v13 = vld [vmem:[%s2343_s19 + $0x64] sm:$0xf]  ;;  %v1874_v28 = vld [vmem:[%s2343_s19 + $0x5c] sm:$0xf] }
  0x69   : > { %1109 = vmatmul.bf16.gmra.mxu2 %v1509_v22  ;;  %v1493_v15 = vor.u32 %v1875_v13, %v1490_v14  ;;  %v1449_v22 = vor.u32 %v1865_v16, %v1446_v17 }
  0x6b   : > { %1179 = vmatpush.bf16.msra.mxu1 %v1945_v19  ;;  %1266 = vmatpush.bf16.msra.mxu0 %v1969_v25  ;;  %v1871_v19 = vld [vmem:[%s2343_s19 + $0x40] sm:$0xf0] }
  0x6c   : > { %1981 = vmatpush.bf16.msra.mxu2 %v1969_v25  ;;  %v1461_v23 = vor.u32 %v1871_v19, %v1460_v18  ;;  %v1884_v25 = vld [vmem:[%s2343_s19 + $0xac] sm:$0xf] }
  0x6f   : > { %1180 = vmatpush.bf16.msra.mxu1 %v1944_v26  ;;  %1267 = vmatpush.bf16.msra.mxu0 %v1968_v31  ;;  %v1526_v26 = vld [vmem:[%s2343_s19 + $0xcc] sm:$0xf0] }
  0x70   : > { %1982 = vmatpush.bf16.msra.mxu2 %v1968_v31  ;;  %v1529_v27 = vor.u32 %v1884_v25, %v1526_v26  ;;  %v1880_v31 = vld [vmem:[%s2343_s19 + $0x88] sm:$0xf0] }
  0x73   : > { %1181 = vmatpush.bf16.msra.mxu1 %v1943_v32  ;;  %1268 = vmatpush.bf16.msra.mxu0 %v1967_v34  ;;  %v1560_v32 = vld [vmem:[%s2343_s19 + $0xf0] sm:$0xf] }
  0x74   : > { %1983 = vmatpush.bf16.msra.mxu2 %v1967_v34  ;;  %v1485_v34 = vor.u32 %v1874_v28, %v1482_v29  ;;  %v1561_v36 = vor.u32 %v1897_v33, %v1560_v32 }
  0x76   : > { %1075 = vmatmul.bf16.gmra.mxu1 %v1469_v43  ;;  %1162 = vmatmul.bf16.gmra.mxu0 %v1481_v44  ;;  %v1889_v43 = vld [vmem:[%s2343_s19 + $0xd0] sm:$0xf0]  ;;  %v1568_v44 = vld [vmem:[%s2343_s19 + $0xf8] sm:$0xf] }
  0x77   : > { %1182 = vmatpush.bf16.msra.mxu1 %v1942_v35  ;;  %1269 = vmatpush.bf16.msra.mxu0 %v1966_v51  ;;  %v1497_v35 = vor.u32 %v1880_v31, %v1496_v30 }
  0x78   : > { %1143 = vmatmul.bf16.gmra.mxu3 %v1549_v48  ;;  %1984 = vmatpush.bf16.msra.mxu2 %v1966_v51 }
  0x79   : > { %1114 = vmatmul.bf16.gmra.mxu2 %v1545_v45  ;;  %v1898_v45 = vld [vmem:[%s2343_s19 + $0x118] sm:$0xf0] }
  0x7a   : > { %v1569_v50 = vor.u32 %v1898_v45, %v1568_v44 }
  0x7b   : > { %1183 = vmatpush.bf16.msra.mxu1 %v1941_v42  ;;  %1270 = vmatpush.bf16.msra.mxu0 %v1965_v53  ;;  %v1532_v42 = vld [vmem:[%s2343_s19 + $0xb0] sm:$0xf] }
  0x7c   : > { %1985 = vmatpush.bf16.msra.mxu2 %v1965_v53  ;;  %v1533_v47 = vor.u32 %v1889_v43, %v1532_v42 }
  0x7f   : > { %1184 = vmatpush.bf16.msra.mxu1 %v1940_v49  ;;  %1271 = vmatpush.bf16.msra.mxu0 %v1964_v55 }
  0x80   : > { %1986 = vmatpush.bf16.msra.mxu2 %v1964_v55  ;;  %v1892_v55 = vld [vmem:[%s2343_s19 + $0xec] sm:$0xf] }
  0x81   : > { %v1557_v57 = vor.u32 %v1892_v55, %v1554_v56 }
  0x83   : > { %1185 = vmatpush.bf16.msra.mxu1 %v1939_v52  ;;  %1272 = vmatpush.bf16.msra.mxu0 %v1963_v3 }
  0x84   : > { %1987 = vmatpush.bf16.msra.mxu2 %v1963_v3 }
  0x86   : > { %1080 = vmatmul.bf16.gmra.mxu1 %v1505_v61  ;;  %1167 = vmatmul.bf16.gmra.mxu0 %v1517_v62 }
  0x88   : > { %1244 = vmatmul.bf16.vlgmr.msrb.gmra.mxu3 %v1457_v2  ;;  %v2070_v2 = vld [vmem:[%s2528_s2] ss:$0 sm:$0xff] }
  0x89   : > { %1215 = vmatmul.bf16.vlgmr.msrb.gmra.mxu2 %v1453_v63 }
  0x96   : > { %1085 = vmatmul.bf16.gmra.mxu1 %v1541_v10  ;;  %1172 = vmatmul.bf16.gmra.mxu0 %v1553_v11 }
  0x98   : > { %1249 = vmatmul.bf16.gmra.mxu3 %v1493_v15 }
  0x99   : > { %1220 = vmatmul.bf16.gmra.mxu2 %v1489_v12 }
  0xa6   : > { %1186 = vmatmul.bf16.vlgmr.msra.gmra.mxu1 %v1449_v22  ;;  %1273 = vmatmul.bf16.vlgmr.msra.gmra.mxu0 %v1461_v23 }
  0xa8   : > { %1254 = vmatmul.bf16.gmra.mxu3 %v1529_v27 }
  0xa9   : > { %1225 = vmatmul.bf16.gmra.mxu2 %v1525_v24 }
  0xb6   : > { %1191 = vmatmul.bf16.gmra.mxu1 %v1485_v34  ;;  %1278 = vmatmul.bf16.gmra.mxu0 %v1497_v35 }
  0xb8   : > { %1259 = vmatmul.bf16.gmra.mxu3 %v1565_v39 }
  0xb9   : > { %1230 = vmatmul.bf16.gmra.mxu2 %v1561_v36 }
  0xc3   : > { %v1052_v48 = vpop.f32.mrf.mxu1  ;;  %v1042_v49 = vpop.f32.mrf.mxu0 }
  0xc4   : > { %v1043_v3 = vadd.f32 %v2070_v2, %v1042_v49  ;;  %v1053_v30 = vadd.f32 %v2070_v2, %v1052_v48 }
  0xc6   : > { %1196 = vmatmul.bf16.gmra.mxu1 %v1521_v46  ;;  %1283 = vmatmul.bf16.gmra.mxu0 %v1533_v47 }
  0xc9   : > { %1288 = vmatmul.bf16.vlgmr.msra.gmra.mxu2 %v1569_v50 }
  0xcb   : > { %v1054_v52 = vpop.f32.mrf.mxu1  ;;  %v1044_v53 = vpop.f32.mrf.mxu0 }
  0xcc   : > { %v1100_v51 = vpop.f32.mrf.mxu2  ;;  %v2423_v54 = vpop.f32.mrf.mxu3  ;;  %v1045_v10 = vadd.f32 %v2070_v2, %v1044_v53  ;;  %v1055_v37 = vadd.f32 %v2070_v2, %v1054_v52 }
  0xd3   : > { %v1057_v59 = vpop.f32.mrf.mxu1  ;;  %v1047_v60 = vpop.f32.mrf.mxu0 }
  0xd4   : > { %v1102_v58 = vpop.f32.mrf.mxu2  ;;  %v2427_v61 = vpop.f32.mrf.mxu3  ;;  %v1048_v17 = vadd.f32 %v2070_v2, %v1047_v60  ;;  %v1058_v44 = vadd.f32 %v2070_v2, %v1057_v59 }
  0xd6   : > { %1201 = vmatmul.bf16.gmra.mxu1 %v1557_v57 }
  0xdb   : > { %v1059_v63 = vpop.f32.mrf.mxu1  ;;  %v1049_v0 = vpop.f32.mrf.mxu0 }
  0xdc   : > { %v1105_v62 = vpop.f32.mrf.mxu2  ;;  %v2429_v1 = vpop.f32.mrf.mxu3  ;;  %v1050_v23 = vadd.f32 %v2070_v2, %v1049_v0 }
  0xe3   : > { %v1071_v5 = vpop.f32.mrf.mxu1  ;;  %v1158_v6 = vpop.f32.mrf.mxu0 }
  0xe4   : > { %v1107_v4 = vpop.f32.mrf.mxu2  ;;  %v1072_v7 = vadd.f32 %v1071_v5, %v1043_v3  ;;  %v2434_v9 = vpop.f32.mrf.mxu3 }
  0xe6   : > { %v1101_v8 = vadd.f32 %v1100_v51, %v1072_v7  ;;  %v1060_v51 = vadd.f32 %v2070_v2, %v1059_v63 }
  0xe8   : > { %v1130_v57 = vadd.f32 %v2423_v54, %v1101_v8 }
  0xea   : > { %v1159_v59 = vadd.f32 %v1158_v6, %v1130_v57 }
  0xeb   : > { %v1073_v12 = vpop.f32.mrf.mxu1  ;;  %v1160_v13 = vpop.f32.mrf.mxu0 }
  0xec   : > { %v1110_v11 = vpop.f32.mrf.mxu2  ;;  %v1074_v14 = vadd.f32 %v1073_v12, %v1045_v10  ;;  %v2436_v16 = vpop.f32.mrf.mxu3 }
  0xee   : > { %v1103_v15 = vadd.f32 %v1102_v58, %v1074_v14 }
  0xf0   : > { %v1132_v5 = vadd.f32 %v2427_v61, %v1103_v15 }
  0xf2   : > { %v1161_v2 = vadd.f32 %v1160_v13, %v1132_v5 }
  0xf3   : > { %v1076_v19 = vpop.f32.mrf.mxu1  ;;  %v1163_v20 = vpop.f32.mrf.mxu0 }
  0xf4   : > { %v1112_v18 = vpop.f32.mrf.mxu2  ;;  %v1077_v21 = vadd.f32 %v1076_v19, %v1048_v17  ;;  %v2438_v25 = vpop.f32.mrf.mxu3 }
  0xf6   : > { %v1106_v22 = vadd.f32 %v1105_v62, %v1077_v21 }
  0xf8   : > { %v1135_v8 = vadd.f32 %v2429_v1, %v1106_v22 }
  0xfa   : > { %v1164_v61 = vadd.f32 %v1163_v20, %v1135_v8 }
  0xfb   : > { %v1078_v26 = vpop.f32.mrf.mxu1  ;;  %v2440_v27 = vpop.f32.mrf.mxu0 }
  0xfc   : > { %v1115_v24 = vpop.f32.mrf.mxu2  ;;  %v1079_v28 = vadd.f32 %v1078_v26, %v1050_v23  ;;  %v2444_v35 = vpop.f32.mrf.mxu3 }
  0xfe   : > { %v1108_v29 = vadd.f32 %v1107_v4, %v1079_v28 }
 0x100   : > { %v1137_v23 = vadd.f32 %v2434_v9, %v1108_v29 }
 0x103   : > { %v1081_v32 = vpop.f32.mrf.mxu1  ;;  %v2442_v33 = vpop.f32.mrf.mxu0 }
 0x104   : > { %v1117_v31 = vpop.f32.mrf.mxu2  ;;  %v1082_v34 = vadd.f32 %v1081_v32, %v1053_v30  ;;  %v2450_v43 = vpop.f32.mrf.mxu3 }
 0x106   : > { %v1111_v36 = vadd.f32 %v1110_v11, %v1082_v34 }
 0x108   : > { %v1140_v20 = vadd.f32 %v2436_v16, %v1111_v36 }
 0x10a   : > { %v1169_v9 = vadd.f32 %v2442_v33, %v1140_v20 }
 0x10b   : > { %v1083_v39 = vpop.f32.mrf.mxu1  ;;  %v2446_v40 = vpop.f32.mrf.mxu0 }
 0x10c   : > { %v1216_v38 = vpop.f32.mrf.mxu2  ;;  %v1084_v41 = vadd.f32 %v1083_v39, %v1055_v37  ;;  %v1245_v50 = vpop.f32.mrf.mxu3 }
 0x10e   : > { %v2448_v42 = vadd.f32 %v1112_v18, %v1084_v41 }
 0x113   : > { %v1086_v46 = vpop.f32.mrf.mxu1  ;;  %v2452_v47 = vpop.f32.mrf.mxu0 }
 0x114   : > { %v1218_v45 = vpop.f32.mrf.mxu2  ;;  %v1087_v48 = vadd.f32 %v1086_v46, %v1058_v44  ;;  %v1247_v60 = vpop.f32.mrf.mxu3 }
 0x116   : > { %v2454_v49 = vadd.f32 %v1115_v24, %v1087_v48 }
 0x11b   : > { %v1088_v53 = vpop.f32.mrf.mxu1  ;;  %v2456_v55 = vpop.f32.mrf.mxu0 }
 0x11c   : > { %v1221_v52 = vpop.f32.mrf.mxu2  ;;  %v1089_v56 = vadd.f32 %v1088_v53, %v1060_v51  ;;  %v1250_v6 = vpop.f32.mrf.mxu3 }
 0x11e   : > { %v2459_v58 = vadd.f32 %v1117_v31, %v1089_v56  ;;  %v1166_v31 = vadd.f32 %v2440_v27, %v1137_v23  ;;  %v1142_v27 = vadd.f32 %v2438_v25, %v2448_v42  ;;  %v1145_v56 = vadd.f32 %v2444_v35, %v2454_v49 }
 0x120   : > { %v1171_v16 = vadd.f32 %v2446_v40, %v1142_v27  ;;  %v1174_v25 = vadd.f32 %v2452_v47, %v1145_v56 }
 0x123   : > { %v1187_v62 = vpop.f32.mrf.mxu1  ;;  %v1274_v0 = vpop.f32.mrf.mxu0 }
 0x124   : > { %v1188_v3 = vadd.f32 %v1187_v62, %v1159_v59  ;;  %v1223_v4 = vpop.f32.mrf.mxu2  ;;  %v1252_v26 = vpop.f32.mrf.mxu3 }
 0x126   : > { %v1217_v7 = vadd.f32 %v1216_v38, %v1188_v3  ;;  %v1147_v3 = vadd.f32 %v2450_v43, %v2459_v58 }
 0x128   : > { %v1246_v63 = vadd.f32 %v1245_v50, %v1217_v7  ;;  %v1176_v35 = vadd.f32 %v2456_v55, %v1147_v3 }
 0x12a   : > { %v1275_v10 = vadd.f32 %v1274_v0, %v1246_v63 }
 0x12b   : > { %v1189_v11 = vpop.f32.mrf.mxu1  ;;  %v1276_v12 = vpop.f32.mrf.mxu0 }
 0x12c   : > { %1294 = vst [vmem:[%s2463_s9] sm:$0xff] %v1275_v10  ;;  %v1190_v54 = vadd.f32 %v1189_v11, %v1161_v2  ;;  %v1226_v17 = vpop.f32.mrf.mxu2  ;;  %v1255_v39 = vpop.f32.mrf.mxu3 }
 0x12e   : > { %v1219_v14 = vadd.f32 %v1218_v45, %v1190_v54 }
 0x130   : > { %v1248_v18 = vadd.f32 %v1247_v60, %v1219_v14 }
 0x132   : > { %v1277_v15 = vadd.f32 %v1276_v12, %v1248_v18 }
 0x133   : > { %v1192_v19 = vpop.f32.mrf.mxu1  ;;  %v1279_v13 = vpop.f32.mrf.mxu0 }
 0x134   : > { %1295 = vst [vmem:[%s2463_s9 + $0x8] sm:$0xff] %v1277_v15  ;;  %v1193_v21 = vadd.f32 %v1192_v19, %v1164_v61  ;;  %v1228_v30 = vpop.f32.mrf.mxu2  ;;  %v1257_v51 = vpop.f32.mrf.mxu3 }
 0x136   : > { %v1222_v24 = vadd.f32 %v1221_v52, %v1193_v21 }
 0x138   : > { %v1251_v28 = vadd.f32 %v1250_v6, %v1222_v24 }
 0x13a   : > { %v1280_v1 = vadd.f32 %v1279_v13, %v1251_v28 }
 0x13b   : > { %v1194_v22 = vpop.f32.mrf.mxu1  ;;  %v1281_v32 = vpop.f32.mrf.mxu0 }
 0x13c   : > { %1296 = vst [vmem:[%s2463_s9 + $0x10] sm:$0xff] %v1280_v1  ;;  %v1195_v34 = vadd.f32 %v1194_v22, %v1166_v31  ;;  %v1231_v41 = vpop.f32.mrf.mxu2  ;;  %v1260_v0 = vpop.f32.mrf.mxu3 }
 0x13e   : > { %v1224_v37 = vadd.f32 %v1223_v4, %v1195_v34 }
 0x140   : > { %v1253_v38 = vadd.f32 %v1252_v26, %v1224_v37 }
 0x142   : > { %v1282_v29 = vadd.f32 %v1281_v32, %v1253_v38 }
 0x143   : > { %v1197_v44 = vpop.f32.mrf.mxu1  ;;  %v1284_v46 = vpop.f32.mrf.mxu0 }
 0x144   : > { %1297 = vst [vmem:[%s2463_s9 + $0x18] sm:$0xff] %v1282_v29  ;;  %v1198_v45 = vadd.f32 %v1197_v44, %v1169_v9  ;;  %v1233_v33 = vpop.f32.mrf.mxu2  ;;  %v1262_v43 = vpop.f32.mrf.mxu3 }
 0x146   : > { %v1227_v48 = vadd.f32 %v1226_v17, %v1198_v45 }
 0x148   : > { %v1256_v50 = vadd.f32 %v1255_v39, %v1227_v48 }
 0x14a   : > { %v1285_v36 = vadd.f32 %v1284_v46, %v1256_v50 }
 0x14b   : > { %v1199_v52 = vpop.f32.mrf.mxu1  ;;  %v1286_v59 = vpop.f32.mrf.mxu0 }
 0x14c   : > { %1298 = vst [vmem:[%s2463_s9 + $0x20] sm:$0xff] %v1285_v36  ;;  %v1200_v53 = vadd.f32 %v1199_v52, %v1171_v16  ;;  %v1289_v5 = vpop.f32.mrf.mxu2 }
 0x14e   : > { %v1229_v57 = vadd.f32 %v1228_v30, %v1200_v53 }
 0x150   : > { %v1258_v60 = vadd.f32 %v1257_v51, %v1229_v57 }
 0x152   : > { %v1287_v42 = vadd.f32 %v1286_v59, %v1258_v60 }
 0x153   : > { %v1202_v62 = vpop.f32.mrf.mxu1 }
 0x154   : > { %1299 = vst [vmem:[%s2463_s9 + $0x28] sm:$0xff] %v1287_v42  ;;  %v1203_v40 = vadd.f32 %v1202_v62, %v1174_v25  ;;  %v1291_v10 = vpop.f32.mrf.mxu2 }
 0x156   : > { %v1232_v4 = vadd.f32 %v1231_v41, %v1203_v40 }
 0x158   : > { %v1261_v7 = vadd.f32 %v1260_v0, %v1232_v4 }
 0x15a   : > { %v1290_v49 = vadd.f32 %v1289_v5, %v1261_v7 }
 0x15b   : > { %v1204_v63 = vpop.f32.mrf.mxu1 }
 0x15c   : > { %1300 = vst [vmem:[%s2463_s9 + $0x30] sm:$0xff] %v1290_v49  ;;  %v1205_v47 = vadd.f32 %v1204_v63, %v1176_v35 }
 0x15e   : > { %v1234_v2 = vadd.f32 %v1233_v33, %v1205_v47 }
 0x160   : > { %v1263_v58 = vadd.f32 %v1262_v43, %v1234_v2 }
 0x162   : > { %v1292_v11 = vadd.f32 %v1291_v10, %v1263_v58 }
 0x164   : > { %1301 = vst [vmem:[%s2463_s9 + $0x38] sm:$0xff] %v1292_v11 }
 0x165   : > { %2158 = shalt.err (!%p2155_p0)
}
 0x166   : > { %s2224_s6 = smov 128   ;;  %s2225_s22 = smov 8  }
 0x167   : > { %1997 = dma.vmem_to_hbm [thread:$0]  (%p2321_p5), %s1318_s28, 1024, %s1320_s21, %s1303_s15, %s2224_s6, %s2224_s6, %s2225_s22  }
 0x168 PF: > { %s1334_s27 = sand.u32 1, %s2197_s12   ;;  %p2008_p3 = pnand %p1421_p11, %p2295_p6 }
 0x169   : > { %s1335_s9 = scalar_lea.sflag [#allocation4], %s1334_s27 }
 0x16a   : > { %p2009_p7 = pneg %p2008_p3 }
 0x16c   : > { %2192 = dma.done.wait (%p2009_p7), %s1335_s9, 1024  }
 0x16d   : > { %2194 = vsyncadd (%p2009_p7), %s1335_s9, 4294966272  ;;  %s20_s17 = sadd.s32 1, %s2217_s17   ;;  %s2536_s12 = smov %s2201_s13 }
 0x16e   : > { %p17_p9 = scmp.ge.s32.totalorder %s20_s17, 4   ;;  %s2537_s13 = smov %s2205_s14 }
 0x16f   : > { %s2538_s14 = smov %s2330_s11  ;;  %s2539_s15 = smov %s2213_s16 }
 0x170   : > { %s2540_s16 = smov %s2542_s5  ;;  %19 = sbr.rel (!%p17_p9) target bundleno = 7 (0x7), region = 81 }
 0x175   :  { %1341 = vsyncpa [#allocation3], 1 }
 0x176   :  { %1343 = vsyncpa [#allocation3 + $0x1], 1 }
 0x177   :  { %1344 = vsyncpa [#allocation6], 1 }
 0x178   :  { %1345 = vsyncpa [#allocation4], 1 }
 0x179   :  { %1347 = vsyncpa [#allocation4 + $0x1], 1 }

</bundles_post_ra>
